<compile_context>
chip_gen: v7x
topology: tpu7x:2x2x1
jax: 0.10.0
libtpu: 0.0.40
codegen_flags: <defaults>
</compile_context>

<pallas_src>
import functools
import math

import numpy as np

import jax
import jax.numpy as jnp
from jax import lax
from jax.experimental import pallas as pl
from jax.experimental.pallas import tpu as pltpu


# ---------------------------------------------------------------------------
# Kernels
# ---------------------------------------------------------------------------

def _kv_pass_kernel(k_ref, v_ref, proj_ref, kv_ref, ksum_ref, *,
                    inv_sqrt_d, mm_dtype):
    """Accumulate KV[r,d] = sum_n K'[n,r] V[n,d] and ksum[r] = sum_n K'[n,r]."""

    @pl.when(pl.program_id(2) == 0)
    def _init():
        kv_ref[...] = jnp.zeros_like(kv_ref)
        ksum_ref[...] = jnp.zeros_like(ksum_ref)

    # Fold 1/sqrt(D) into the small projection matrix instead of scaling the
    # (tile, R) matmul result (removes 2*tile*R VPU multiplies per step).
    proj = (proj_ref[...].astype(jnp.float32) * inv_sqrt_d).astype(mm_dtype)

    k = k_ref[0, 0].astype(mm_dtype)                              # (tk, D)
    k_proj = jnp.dot(k, proj, preferred_element_type=jnp.float32)  # (tk, R) f32
    k_prime = jnp.exp(jnp.clip(k_proj, -10.0, 10.0))               # f32 exp/clip

    # ksum: sublane (XLU) reduce, accumulated in f32.
    ksum_ref[0, 0] += jnp.sum(k_prime, axis=0, keepdims=True)      # (1, R)

    # KV += K'^T V : contract the sequence axis without materializing K'^T.
    v = v_ref[0, 0].astype(mm_dtype)                               # (tk, D)
    kv_ref[0, 0] += lax.dot_general(
        k_prime.astype(mm_dtype), v,
        dimension_numbers=(((0,), (0,)), ((), ())),
        preferred_element_type=jnp.float32)                        # (R, D) f32


def _q_pass_kernel(q_ref, kv_ref, ksum_ref, proj_ref, o_ref, *,
                   inv_sqrt_d, mm_dtype, approx_reciprocal):
    proj = (proj_ref[...].astype(jnp.float32) * inv_sqrt_d).astype(mm_dtype)

    q = q_ref[0, 0].astype(mm_dtype)                               # (tq, D)
    q_proj = jnp.dot(q, proj, preferred_element_type=jnp.float32)   # (tq, R) f32
    q_prime = jnp.exp(jnp.clip(q_proj, -10.0, 10.0))                # f32

    out = jnp.dot(q_prime.astype(mm_dtype), kv_ref[0, 0].astype(mm_dtype),
                  preferred_element_type=jnp.float32)               # (tq, D) f32

    # Normalizer kept in f32 (VPU multiply + XLU lane reduce): avoids the bf16
    # round-off on large K'-sums flagged in the review.
    norm = jnp.sum(q_prime * ksum_ref[0, 0], axis=-1, keepdims=True)  # (tq, 1)
    norm = jnp.maximum(norm, 1e-6)
    if approx_reciprocal:
        inv_norm = pl.reciprocal(norm, approx=True)                # EUP slot
    else:
        inv_norm = 1.0 / norm

    o_ref[0, 0] = (out * inv_norm).astype(o_ref.dtype)


# ---------------------------------------------------------------------------
# Wrapper
# ---------------------------------------------------------------------------

def _pick_seq_tile(n, max_rows, sublane):
    """Largest sequence tile that divides n, is <= max_rows and sublane-aligned."""
    max_rows = int(max(max_rows, 1))
    if n <= max_rows:
        return n
    t = (max_rows // sublane) * sublane
    while t >= sublane:
        if n % t == 0:
            return t
        t -= sublane
    # No aligned divisor under the budget: fall back to the full sequence
    # (still correct; only worse for VMEM on pathological N).
    return n


def _vmem_budget_bytes():
    cap = None
    try:
        cap = getattr(pltpu.get_tpu_info(), "vmem_capacity_bytes", None)
    except Exception:
        cap = None
    if not cap:
        cap = 64 * 1024 * 1024          # conservative default (v7x per-TC VMEM)
    return int(cap * 3 // 4)            # ~48 MiB on v7x, ~96 MiB on v5e/v6e


def performer_attention(Q, K, V, proj_matrix, *,
                        mxu_dtype=jnp.bfloat16,
                        approx_reciprocal=True,
                        seq_tile=None,
                        vmem_budget_bytes=None,
                        stream_buffers=None):
    """Performer attention forward.  Q/K/V: (B, H, N, D); proj_matrix: (D, R)."""
    B, H, N, D = Q.shape
    R = proj_matrix.shape[-1]

    in_dtype = np.dtype(Q.dtype)
    mm_dtype = np.dtype(mxu_dtype) if mxu_dtype is not None else in_dtype
    inv_sqrt_d = 1.0 / math.sqrt(D)
    in_bytes = in_dtype.itemsize
    mm_bytes = mm_dtype.itemsize
    sublane = max(8, 32 // in_bytes)    # 8 for f32, 16 for bf16, 32 for 1-byte

    if vmem_budget_bytes is None:
        vmem_budget_bytes = _vmem_budget_bytes()

    if seq_tile is None:
        # Per-sequence-row VMEM: 2 double-buffered streamed blocks (q|k, o|v),
        # f32 x_proj + x_prime, one mxu-dtype copy, f32 out tile, slack.
        per_row = 4 * D * in_bytes + 8 * R + mm_bytes * R + 4 * D + 64
        fixed = (2 * D * R * (in_bytes + 4)      # proj block + scaled copy
                 + 4 * R * (D + 1) * 4           # kv + ksum blocks (f32, dbl-buf)
                 + (2 << 20))                    # compiler scratch headroom
        seq_tile = _pick_seq_tile(N, (vmem_budget_bytes - fixed) // per_row, sublane)
    else:
        seq_tile = _pick_seq_tile(N, seq_tile, sublane)

    n_tiles = N // seq_tile

    def stream_spec(block_shape, index_map):
        # Deeper pipelining on the streamed operands (e.g. 3 on v5e, where the
        # lower HBM bandwidth is most likely to expose the fetch).
        if stream_buffers is not None and stream_buffers != 2:
            return pl.BlockSpec(block_shape, index_map,
                                pipeline_mode=pl.Buffered(stream_buffers))
        return pl.BlockSpec(block_shape, index_map)

    seq_spec = stream_spec((1, 1, seq_tile, D), lambda b, h, t: (b, h, t, 0))
    proj_spec = pl.BlockSpec((D, R), lambda b, h, t: (0, 0))
    kv_spec = pl.BlockSpec((1, 1, R, D), lambda b, h, t: (b, h, 0, 0))
    ksum_spec = pl.BlockSpec((1, 1, 1, R), lambda b, h, t: (b, h, 0, 0))

    # ---- pass 1: KV / ksum accumulation over the K/V sequence axis ----------
    kv_flops = 4 * B * H * N * D * R
    kv_bytes = (2 * B * H * N * D + D * R) * in_bytes + B * H * R * (D + 1) * 4
    kv, ksum = pl.pallas_call(
        functools.partial(_kv_pass_kernel, inv_sqrt_d=inv_sqrt_d, mm_dtype=mm_dtype),
        out_shape=(jax.ShapeDtypeStruct((B, H, R, D), jnp.float32),
                   jax.ShapeDtypeStruct((B, H, 1, R), jnp.float32)),
        grid_spec=pltpu.PrefetchScalarGridSpec(
            num_scalar_prefetch=0,
            grid=(B, H, n_tiles),
            in_specs=[seq_spec, seq_spec, proj_spec],
            out_specs=(kv_spec, ksum_spec)),
        compiler_params=pltpu.CompilerParams(
            dimension_semantics=("parallel", "parallel", "arbitrary"),
            vmem_limit_bytes=vmem_budget_bytes),
        cost_estimate=pl.CostEstimate(
            flops=kv_flops,
            transcendentals=B * H * N * R,
            bytes_accessed=kv_bytes),
    )(K, V, proj_matrix)

    # ---- pass 2: stream Q tiles, apply KV / ksum, normalize, store ----------
    q_flops = 2 * B * H * N * R * (2 * D + 1)
    q_bytes = (2 * B * H * N * D + D * R) * in_bytes + B * H * R * (D + 1) * 4
    out = pl.pallas_call(
        functools.partial(_q_pass_kernel, inv_sqrt_d=inv_sqrt_d,
                          mm_dtype=mm_dtype, approx_reciprocal=approx_reciprocal),
        out_shape=jax.ShapeDtypeStruct((B, H, N, D), Q.dtype),
        grid_spec=pltpu.PrefetchScalarGridSpec(
            num_scalar_prefetch=0,
            grid=(B, H, n_tiles),
            in_specs=[seq_spec, kv_spec, ksum_spec, proj_spec],
            out_specs=pl.BlockSpec((1, 1, seq_tile, D),
                                   lambda b, h, t: (b, h, t, 0))),
        compiler_params=pltpu.CompilerParams(
            dimension_semantics=("parallel", "parallel", "parallel"),
            vmem_limit_bytes=vmem_budget_bytes),
        cost_estimate=pl.CostEstimate(
            flops=q_flops,
            transcendentals=B * H * N * (R + 1),
            bytes_accessed=q_bytes),
    )(Q, kv, ksum, proj_matrix)
    return out


# ---------------------------------------------------------------------------
# Reference + test
# ---------------------------------------------------------------------------

def performer_reference(Q, K, V, proj_matrix):
    d = Q.shape[-1]
    hi = lax.Precision.HIGHEST

    def orf(x):
        xp = jnp.einsum('bhnd,dr->bhnr', x, proj_matrix, precision=hi) / math.sqrt(d)
        return jnp.exp(jnp.clip(xp, -10.0, 10.0))

    Qp, Kp = orf(Q), orf(K)
    KV = jnp.einsum('bhnr,bhnd->bhrd', Kp, V, precision=hi)
    out = jnp.einsum('bhnr,bhrd->bhnd', Qp, KV, precision=hi)
    norm = jnp.einsum('bhnr,bhr->bhn', Qp, Kp.sum(axis=2), precision=hi)
    norm = jnp.maximum(norm, 1e-6)
    return out / norm[..., None]


if __name__ == "__main__":
    # Module config: dim=32, n_heads=2 -> head_dim=16; feature_dim=32.
    B, H, N, D, R = 2, 2, 8, 16, 32

    key = jax.random.PRNGKey(0)
    kq, kk, kvv, kp = jax.random.split(key, 4)
    Q = jax.random.normal(kq, (B, H, N, D), dtype=jnp.float32)
    K = jax.random.normal(kk, (B, H, N, D), dtype=jnp.float32)
    V = jax.random.normal(kvv, (B, H, N, D), dtype=jnp.float32)
    # Deterministic stand-in for nn.Parameter(torch.randn(head_dim, feature_dim)).
    proj_matrix = jax.random.normal(kp, (D, R), dtype=jnp.float32)

    ref = performer_reference(Q, K, V, proj_matrix)

    # 1) dtype-exact path (input-dtype MXU, exact reciprocal): tight check.
    out = performer_attention(Q, K, V, proj_matrix,
                              mxu_dtype=None, approx_reciprocal=False)
    out = jax.block_until_ready(out)
    assert out.shape == (B, H, N, D)
    assert jnp.allclose(out, ref, rtol=5e-3, atol=5e-3), "exact-path mismatch"

    # 2) default fast path (bf16 MXU inputs, EUP approximate reciprocal).
    out_fast = jax.block_until_ready(performer_attention(Q, K, V, proj_matrix))
    assert out_fast.shape == (B, H, N, D)
    assert jnp.allclose(out_fast, ref, rtol=5e-2, atol=5e-2), "bf16-path mismatch"

    # 3) multi-tile sequence path: force a small tile so the KV accumulation
    #    (pl.when init + f32-resident output accumulator) actually iterates.
    B2, H2, N2 = 1, 2, 64
    k2 = jax.random.split(jax.random.PRNGKey(1), 3)
    Q2 = jax.random.normal(k2[0], (B2, H2, N2, D), dtype=jnp.float32)
    K2 = jax.random.normal(k2[1], (B2, H2, N2, D), dtype=jnp.float32)
    V2 = jax.random.normal(k2[2], (B2, H2, N2, D), dtype=jnp.float32)
    ref2 = performer_reference(Q2, K2, V2, proj_matrix)
    out2 = performer_attention(Q2, K2, V2, proj_matrix, seq_tile=16,
                               mxu_dtype=None, approx_reciprocal=False)
    out2 = jax.block_until_ready(out2)
    assert jnp.allclose(out2, ref2, rtol=5e-3, atol=5e-3), "tiled-path mismatch"

    print("KERNEL_OK")
</pallas_src>

<mosaic_0001>
module attributes {stable_mosaic.version = 11 : i64} {
  func.func @_kv_pass_kernel(%arg0: i32, %arg1: i32, %arg2: i32, %arg3: memref<1x1x8x16xf32, #tpu.memory_space<vmem>>, %arg4: memref<1x1x8x16xf32, #tpu.memory_space<vmem>>, %arg5: memref<16x32xf32, #tpu.memory_space<vmem>>, %arg6: memref<1x1x32x16xf32, #tpu.memory_space<vmem>>, %arg7: memref<1x1x1x32xf32, #tpu.memory_space<vmem>>) attributes {dimension_semantics = [#tpu.dimension_semantics<parallel>, #tpu.dimension_semantics<parallel>, #tpu.dimension_semantics<arbitrary>], iteration_bounds = array<i64: 2, 2, 1>, scalar_prefetch = 0 : i64, scratch_operands = 0 : i64, tpu.core_type = #tpu.core_type<tc>, window_params = [{transform_indices = @transform_0, window_bounds = array<i64: 1, 1, 8, 16>}, {transform_indices = @transform_1, window_bounds = array<i64: 1, 1, 8, 16>}, {pipeline_mode = #tpu.pipeline_mode<synchronous>, transform_indices = @transform_2, window_bounds = array<i64: 16, 32>}, {transform_indices = @transform_3, window_bounds = array<i64: 1, 1, 32, 16>}, {transform_indices = @transform_4, window_bounds = array<i64: 1, 1, 1, 32>}]} {
    %c0_i32 = arith.constant 0 : i32
    %0 = arith.cmpi eq, %arg2, %c0_i32 : i32
    %1 = arith.extui %0 : i1 to i32
    %c0_i32_0 = arith.constant 0 : i32
    %2 = arith.cmpi ne, %1, %c0_i32_0 : i32
    scf.if %2 {
      %cst_31 = arith.constant 0.000000e+00 : f32
      %31 = vector.broadcast %cst_31 : f32 to vector<1x1x32x16xf32>
      %c0_32 = arith.constant 0 : index
      %c0_33 = arith.constant 0 : index
      %c0_34 = arith.constant 0 : index
      %c0_35 = arith.constant 0 : index
      %32 = vector.load %arg6[%c0_32, %c0_33, %c0_34, %c0_35] : memref<1x1x32x16xf32, #tpu.memory_space<vmem>>, vector<1x1x32x16xf32>
      tpu.vector_store %arg6[%c0_32, %c0_33, %c0_34, %c0_35], %31 {strides = array<i32>} : memref<1x1x32x16xf32, #tpu.memory_space<vmem>>, vector<1x1x32x16xf32>,
      %cst_36 = arith.constant 0.000000e+00 : f32
      %33 = vector.broadcast %cst_36 : f32 to vector<1x1x1x32xf32>
      %c0_37 = arith.constant 0 : index
      %c0_38 = arith.constant 0 : index
      %c0_39 = arith.constant 0 : index
      %c0_40 = arith.constant 0 : index
      %34 = vector.load %arg7[%c0_37, %c0_38, %c0_39, %c0_40] : memref<1x1x1x32xf32, #tpu.memory_space<vmem>>, vector<1x1x1x32xf32>
      tpu.vector_store %arg7[%c0_37, %c0_38, %c0_39, %c0_40], %33 {strides = array<i32>} : memref<1x1x1x32xf32, #tpu.memory_space<vmem>>, vector<1x1x1x32xf32>,
    } else {
    }
    %c0 = arith.constant 0 : index
    %c0_1 = arith.constant 0 : index
    %3 = vector.load %arg5[%c0, %c0_1] : memref<16x32xf32, #tpu.memory_space<vmem>>, vector<16x32xf32>
    %cst = arith.constant 2.500000e-01 : f32
    %4 = vector.broadcast %cst : f32 to vector<16x32xf32>
    %5 = arith.mulf %3, %4 : vector<16x32xf32>
    %c0_2 = arith.constant 0 : index
    %c0_3 = arith.constant 0 : index
    %c0_4 = arith.constant 0 : index
    %c0_5 = arith.constant 0 : index
    %6 = vector.load %arg3[%c0_2, %c0_3, %c0_4, %c0_5] : memref<1x1x8x16xf32, #tpu.memory_space<vmem>>, vector<1x1x8x16xf32>
    %7 = vector.shape_cast %6 : vector<1x1x8x16xf32> to vector<8x16xf32>
    %cst_6 = arith.constant dense<0.000000e+00> : vector<8x32xf32>
    %8 = tpu.matmul %7, %5, %cst_6 {dimension_numbers = #tpu.dot_dimension_numbers<[1], [0], [0], [1], [0, 0, 1, 1], [], []>} : vector<8x16xf32>, vector<16x32xf32>, vector<8x32xf32> -> vector<8x32xf32>
    %cst_7 = arith.constant -1.000000e+01 : f32
    %cst_8 = arith.constant 1.000000e+01 : f32
    %9 = vector.broadcast %cst_7 : f32 to vector<8x32xf32>
    %10 = arith.maximumf %9, %8 : vector<8x32xf32>
    %11 = vector.broadcast %cst_8 : f32 to vector<8x32xf32>
    %12 = arith.minimumf %11, %10 : vector<8x32xf32>
    %13 = math.exp %12 : vector<8x32xf32>
    %c0_9 = arith.constant 0 : index
    %c0_10 = arith.constant 0 : index
    %c0_11 = arith.constant 0 : index
    %c0_12 = arith.constant 0 : index
    %14 = vector.load %arg7[%c0_9, %c0_10, %c0_11, %c0_12] : memref<1x1x1x32xf32, #tpu.memory_space<vmem>>, vector<1x1x1x32xf32>
    %15 = vector.shape_cast %14 : vector<1x1x1x32xf32> to vector<1x32xf32>
    %cst_13 = arith.constant dense<0.000000e+00> : vector<32xf32>
    %16 = vector.multi_reduction <add>, %13, %cst_13 [0] : vector<8x32xf32> to vector<32xf32>
    %17 = vector.shape_cast %16 : vector<32xf32> to vector<1x32xf32>
    %18 = arith.addf %15, %17 : vector<1x32xf32>
    %c0_14 = arith.constant 0 : index
    %c0_15 = arith.constant 0 : index
    %c0_16 = arith.constant 0 : index
    %c0_17 = arith.constant 0 : index
    %19 = vector.load %arg7[%c0_14, %c0_15, %c0_16, %c0_17] : memref<1x1x1x32xf32, #tpu.memory_space<vmem>>, vector<1x1x1x32xf32>
    %20 = vector.shape_cast %19 : vector<1x1x1x32xf32> to vector<1x32xf32>
    %21 = vector.shape_cast %18 : vector<1x32xf32> to vector<1x1x1x32xf32>
    tpu.vector_store %arg7[%c0_14, %c0_15, %c0_16, %c0_17], %21 {strides = array<i32>} : memref<1x1x1x32xf32, #tpu.memory_space<vmem>>, vector<1x1x1x32xf32>,
    %c0_18 = arith.constant 0 : index
    %c0_19 = arith.constant 0 : index
    %c0_20 = arith.constant 0 : index
    %c0_21 = arith.constant 0 : index
    %22 = vector.load %arg4[%c0_18, %c0_19, %c0_20, %c0_21] : memref<1x1x8x16xf32, #tpu.memory_space<vmem>>, vector<1x1x8x16xf32>
    %23 = vector.shape_cast %22 : vector<1x1x8x16xf32> to vector<8x16xf32>
    %c0_22 = arith.constant 0 : index
    %c0_23 = arith.constant 0 : index
    %c0_24 = arith.constant 0 : index
    %c0_25 = arith.constant 0 : index
    %24 = vector.load %arg6[%c0_22, %c0_23, %c0_24, %c0_25] : memref<1x1x32x16xf32, #tpu.memory_space<vmem>>, vector<1x1x32x16xf32>
    %25 = vector.shape_cast %24 : vector<1x1x32x16xf32> to vector<32x16xf32>
    %cst_26 = arith.constant dense<0.000000e+00> : vector<32x16xf32>
    %26 = tpu.matmul %13, %23, %cst_26 {dimension_numbers = #tpu.dot_dimension_numbers<[0], [0], [1], [1], [0, 1, 1, 1], [], []>} : vector<8x32xf32>, vector<8x16xf32>, vector<32x16xf32> -> vector<32x16xf32>
    %27 = arith.addf %25, %26 : vector<32x16xf32>
    %c0_27 = arith.constant 0 : index
    %c0_28 = arith.constant 0 : index
    %c0_29 = arith.constant 0 : index
    %c0_30 = arith.constant 0 : index
    %28 = vector.load %arg6[%c0_27, %c0_28, %c0_29, %c0_30] : memref<1x1x32x16xf32, #tpu.memory_space<vmem>>, vector<1x1x32x16xf32>
    %29 = vector.shape_cast %28 : vector<1x1x32x16xf32> to vector<32x16xf32>
    %30 = vector.shape_cast %27 : vector<32x16xf32> to vector<1x1x32x16xf32>
    tpu.vector_store %arg6[%c0_27, %c0_28, %c0_29, %c0_30], %30 {strides = array<i32>} : memref<1x1x32x16xf32, #tpu.memory_space<vmem>>, vector<1x1x32x16xf32>,
    return
  }
  func.func @transform_0(%arg0: i32, %arg1: i32, %arg2: i32) -> (i32, i32, i32, i32) {
    %c0_i32 = arith.constant 0 : i32
    %c0_i32_0 = arith.constant 0 : i32
    return %arg0, %arg1, %arg2, %c0_i32 : i32, i32, i32, i32
  }
  func.func @transform_1(%arg0: i32, %arg1: i32, %arg2: i32) -> (i32, i32, i32, i32) {
    %c0_i32 = arith.constant 0 : i32
    %c0_i32_0 = arith.constant 0 : i32
    return %arg0, %arg1, %arg2, %c0_i32 : i32, i32, i32, i32
  }
  func.func @transform_2(%arg0: i32, %arg1: i32, %arg2: i32) -> (i32, i32) {
    %c0_i32 = arith.constant 0 : i32
    %c0_i32_0 = arith.constant 0 : i32
    %c0_i32_1 = arith.constant 0 : i32
    return %c0_i32, %c0_i32_0 : i32, i32
  }
  func.func @transform_3(%arg0: i32, %arg1: i32, %arg2: i32) -> (i32, i32, i32, i32) {
    %c0_i32 = arith.constant 0 : i32
    %c0_i32_0 = arith.constant 0 : i32
    %c0_i32_1 = arith.constant 0 : i32
    return %arg0, %arg1, %c0_i32, %c0_i32_0 : i32, i32, i32, i32
  }
  func.func @transform_4(%arg0: i32, %arg1: i32, %arg2: i32) -> (i32, i32, i32, i32) {
    %c0_i32 = arith.constant 0 : i32
    %c0_i32_0 = arith.constant 0 : i32
    %c0_i32_1 = arith.constant 0 : i32
    return %arg0, %arg1, %c0_i32, %c0_i32_0 : i32, i32, i32, i32
  }
}

</mosaic_0001>

<bundles_post_ra>
// kernel: tpu_custom_call.1
= control target key start
LH: loop header
LB: loop body
LE: loop exit
PB: predicated region body
PF: predicated region fallthrough
CT: control target
= control target key end

     0   :  { %s1452_s0 = inlined_call_operand.hbm [shape: f32[2,2,8,16], index: 0, kind: input, shape index: {}]   ;;  %s1453_s1 = inlined_call_operand.hbm [shape: f32[2,2,8,16], index: 1, kind: input, shape index: {}]   ;;  %s1454_s2 = inlined_call_operand.hbm [shape: f32[16,32], index: 2, kind: input, shape index: {}]   ;;  %s1455_s3 = inlined_call_operand.vmem [shape: f32[2,2,32,16], index: 3, kind: output, shape index: {0}]   ;;  %s1456_s4 = inlined_call_operand.hbm [shape: f32[2,2,1,32], index: 4, kind: output, shape index: {1}]  }
   0x1   :  { %1466 = sst [smem:[#allocation17_spill]] %s1454_s2 }
   0x2   :  { %1467 = sst [smem:[#allocation18_spill]] %s1456_s4 }
   0x3   :  { %10 = vsyncpa [#allocation3], 0 }
   0x4   :  { %12 = vsyncpa [#allocation3 + $0x1], 0 }
   0x5   :  { %13 = vsyncpa [#allocation6], 0 }
   0x6   :  { %15 = vsyncpa [#allocation6 + $0x1], 0 }
   0x7   :  { %16 = vsyncpa [#allocation4], 0 }
   0x8   :  { %18 = vsyncpa [#allocation4 + $0x1], 0  ;;  %s1143_s15 = smov 0   ;;  %s1145_s16 = smov 0  }
   0x9   :  { %s1147_s17 = smov 0   ;;  %s1149_s18 = smov 0  }
   0xa   :  { %s1151_s19 = smov 0   ;;  %s1153_s20 = smov 0  }
   0xb   :  { %s1155_s21 = smov 0   ;;  %s1157_s22 = smov 0  }
   0xc LB: > { %1468 = sst [smem:[#allocation13_spill]] %s1079_s15  ;;  %s1184_s23 = sadd.s32 4294967295, %s1107_s22   ;;  %s1107_s22 = sphi %s1157_s22, %s24_s22   ;;  %s1103_s21 = sphi %s1155_s21, %s1498_s21   ;;  %s1099_s20 = sphi %s1153_s20, %s1497_s20   ;;  %s1095_s19 = sphi %s1151_s19, %s1496_s19   ;;  %s1091_s18 = sphi %s1149_s18, %s1495_s18   ;;  %s1087_s17 = sphi %s1147_s17, %s1494_s17   ;;  %s1083_s16 = sphi %s1145_s16, %s1493_s16   ;;  %s1079_s15 = sphi %s1143_s15, %s1492_s15  }
   0xd   : > { %s759_s24 = sadd.s32 4294967294, %s1107_s22   ;;  %p67_p0 = scmp.ne.s32.totalorder %s1083_s16, %s1079_s15 }
   0xe   : > { %p1457_p1 = scmp.eq.s32.totalorder %s1184_s23, 0  ;;  %p178_p3 = scmp.eq.s32.totalorder %s759_s24, 3 }
   0xf   : > { %p760_p5 = scmp.ge.s32.totalorder %s1107_s22, 1  ;;  %p185_p7 = scmp.lt.s32.totalorder %s1107_s22, 5 }
  0x10   : > { %p1193_p4 = por %p1457_p1, %p67_p0  ;;  %p1198_p6 = por %p178_p3, %p67_p0 }
  0x11   : > { %p1203_p8 = pnand %p760_p5, %p185_p7  ;;  %s1109_s28 = smov [#allocation7]  }
  0x12   : > { %s1469_s25 = scalar_select %p1193_p4, 1, 0 }
  0x13   : > { %s1470_s26 = scalar_select %p1198_p6, 1, 0 }
  0x14   : > { %s1472_s27 = scalar_select %p1203_p8, 1, 0 }
  0x15   : > { %1471 = sst [smem:[#allocation14_spill]] %s1470_s26  ;;  %s197_s29 = sshll.u32 %s1109_s28, 4  ;;  %s198_s29 = int_to_ptr.vmem [resolvable:$true] %s197_s29 }
  0x16   : > { %p822_p9 = pneg %p1203_p8  ;;  %s1474_s2 = sld [smem:[#allocation17_spill]] }
  0x18   : > { %p1211_p10 = pnand %p822_p9, %p1457_p1 }
  0x1a   : > { %p915_p12 = pneg %p1211_p10 }
  0x1c   : > { %s913_s7 = scalar_lea.hbm %s1474_s2, 256 }
  0x1d   : > { %p914_p11 = scmp.ne.s32.totalorder %s1474_s2, %s913_s7  ;;  %p920_p3 = scmp.lt.u32.totalorder %s913_s7, %s1474_s2 }
  0x1f   : > { %p916_p13 = pnand %p915_p12, %p914_p11 }
  0x21   : > { %p917_p0 = pneg %p916_p13 }
  0x23   : > { %p922_p5 = pnand %p920_p3, %p917_p0 }
  0x25   : > { %925 = shalt.err (!%p922_p5)
}
  0x26   : > { %s926_s12 = scalar_lea.vmem %s198_s29, 256  ;;  %p934_p2 = scmp.lt.s32.totalorder %s198_s29, %s198_s29 }
  0x27   : > { %p927_p7 = scmp.ne.s32.totalorder %s198_s29, %s926_s12  ;;  %p935_p6 = scmp.lt.s32.totalorder %s926_s12, %s926_s12 }
  0x29   : > { %p929_p9 = pnand %p927_p7, %p915_p12  ;;  %p936_p4 = por %p935_p6, %p934_p2 }
  0x2b   : > { %p930_p1 = pneg %p929_p9 }
  0x2d   : > { %p937_p8 = pnand %p936_p4, %p930_p1 }
  0x2f   : > { %940 = shalt.err (!%p937_p8)
}
  0x30   : > { %s1110_s13 = smov 128   ;;  %s1111_s14 = smov 8  }
  0x31   : > { %825 = dma.hbm_to_vmem [thread:$0]  (!%p1211_p10), %s1474_s2, 256, %s198_s29, [#allocation6], %s1110_s13, %s1110_s13, %s1111_s14  }
  0x32   : > { %s39_s5 = sadd.s32 1, %s1099_s20  ;;  %s43_s6 = sadd.s32 1, %s1103_s21 }
  0x33   : > { %p41_p1 = scmp.ge.s32.totalorder %s39_s5, 2  ;;  %s54_s7 = sadd.s32 1, %s1087_s17 }
  0x34   : > { %p61_p2 = scmp.ne.s32.totalorder %s1087_s17, %s1083_s16  ;;  %p62_p4 = scmp.eq.s32.totalorder %s1107_s22, 0 }
  0x35   : > { %s1500_s5 = smov (%p41_p1, %s39_s5), 0  ;;  %s1502_s6 = smov (!%p41_p1, %s43_s6), %s1103_s21 }
  0x36   : > { %1475 = sst [smem:[#allocation15_spill]] %s1500_s5  ;;  %s48_s8 = ssub.s32 %s1099_s20, %s1500_s5 }
  0x37   : > { %p45_p6 = scmp.ge.s32.totalorder %s1502_s6, 2  ;;  %p1476_p8 = scmp.eq.s32.totalorder %s1184_s23, 3 }
  0x38   : > { %p1248_p10 = por %p62_p4, %p61_p2  ;;  %p838_p12 = scmp.lt.s32.totalorder %s1107_s22, 4 }
  0x39   : > { %p1244_p11 = por %p1476_p8, %p61_p2  ;;  %s1504_s6 = smov (%p45_p6, %s1502_s6), 0 }
  0x3a   : > { %1479 = sst [smem:[#allocation16_spill]] %s1504_s6  ;;  %s211_s9 = sand.u32 1, %s1087_s17  }
  0x3b   : > { %s1477_s30 = scalar_select %p1244_p11, 1, 0 }
  0x3c   : > { %s764_s10 = sshll.u32 %s1103_s21, 1  ;;  %s47_s11 = ssub.s32 %s1103_s21, %s1504_s6 }
  0x3d   : > { %s49_s12 = sor.u32 %s48_s8, %s47_s11  ;;  %s1259_s13 = sshll.u32 %s211_s9, 3 }
  0x3e   : > { %p52_p13 = scmp.eq.s32.totalorder %s49_s12, 0  ;;  %s221_s14 = sadd.s32 %s1099_s20, %s764_s10 }
  0x3f   : > { %s215_s24 = scalar_lea.vmem [#allocation2], %s1259_s13  ;;  %s765_s5 = sshll.u32 %s221_s14, 7 }
  0x40   : > { %s225_s28 = sshll.u32 %s215_s24, 4  ;;  %s1271_s4 = scalar_lea.hbm %s1452_s0, %s765_s5  ;;  %s1266_s28 = int_to_ptr.vmem [resolvable:$true] %s225_s28 }
  0x41   : > { %s1264_s2 = scalar_select %p52_p13, %s1087_s17, %s54_s7  }
  0x42   : > { %p1277_p0 = pnand %p838_p12, %p1248_p10  ;;  %s1284_s11 = scalar_lea.hbm %s1453_s1, %s765_s5 }
  0x43   : > { %s232_s15 = sand.u32 1, %s1107_s22   ;;  %s212_s26 = scalar_lea.sflag [#allocation3], %s211_s9 }
  0x44   : > { %s941_s12 = scalar_lea.hbm %s1271_s4, 128  ;;  %p943_p5 = pneg %p1277_p0 }
  0x45   : > { %p942_p3 = scmp.ne.s32.totalorder %s1271_s4, %s941_s12  ;;  %s946_s24 = scalar_lea.hbm %s1452_s0, 512 }
  0x46   : > { %p947_p1 = scmp.lt.u32.totalorder %s1271_s4, %s1452_s0  ;;  %p948_p2 = scmp.lt.u32.totalorder %s946_s24, %s941_s12 }
  0x47   : > { %p944_p7 = pnand %p943_p5, %p942_p3  ;;  %p950_p6 = scmp.lt.u32.totalorder %s941_s12, %s1271_s4 }
  0x48   : > { %p949_p4 = por %p948_p2, %p947_p1 }
  0x49   : > { %p945_p9 = pneg %p944_p7 }
  0x4a   : > { %p951_p8 = por %p950_p6, %p949_p4 }
  0x4c   : > { %p952_p10 = pnand %p951_p8, %p945_p9 }
  0x4e   : > { %955 = shalt.err (!%p952_p10)
}
  0x4f   : > { %s956_s5 = scalar_lea.vmem %s1266_s28, 128  ;;  %s1112_s9 = smov [#allocation2]  }
  0x50   : > { %p957_p12 = scmp.ne.s32.totalorder %s1266_s28, %s956_s5  ;;  %s961_s10 = sshll.u32 %s1112_s9, 4  ;;  %s962_s10 = int_to_ptr.vmem [resolvable:$false] %s961_s10 }
  0x51   : > { %s963_s6 = scalar_lea.vmem %s962_s10, 256  ;;  %p964_p7 = scmp.lt.s32.totalorder %s1266_s28, %s962_s10 }
  0x52   : > { %p959_p13 = pnand %p957_p12, %p943_p5  ;;  %p965_p1 = scmp.lt.s32.totalorder %s963_s6, %s956_s5 }
  0x54   : > { %p960_p3 = pneg %p959_p13  ;;  %p966_p2 = por %p965_p1, %p964_p7 }
  0x56   : > { %p967_p4 = pnand %p966_p2, %p960_p3 }
  0x58   : > { %970 = shalt.err (!%p967_p4)
}
  0x59   : > { %829 = dma.hbm_to_vmem [thread:$0]  (!%p1277_p0), %s1271_s4, 128, %s1266_s28, %s212_s26  }
  0x5a   : > { %s236_s12 = scalar_lea.vmem [#allocation5], %s1259_s13  ;;  %s233_s14 = scalar_lea.sflag [#allocation6], %s232_s15 }
  0x5b   : > { %s246_s29 = sshll.u32 %s236_s12, 4  ;;  %s971_s24 = scalar_lea.hbm %s1284_s11, 128  ;;  %s247_s29 = int_to_ptr.vmem [resolvable:$true] %s246_s29 }
  0x5c   : > { %p972_p9 = scmp.ne.s32.totalorder %s1284_s11, %s971_s24  ;;  %s976_s9 = scalar_lea.hbm %s1453_s1, 512 }
  0x5d   : > { %p977_p10 = scmp.lt.u32.totalorder %s1284_s11, %s1453_s1  ;;  %p978_p12 = scmp.lt.u32.totalorder %s976_s9, %s971_s24 }
  0x5e   : > { %p974_p6 = pnand %p972_p9, %p943_p5  ;;  %p980_p3 = scmp.lt.u32.totalorder %s971_s24, %s1284_s11 }
  0x5f   : > { %p979_p13 = por %p978_p12, %p977_p10 }
  0x60   : > { %p975_p8 = pneg %p974_p6 }
  0x61   : > { %p981_p7 = por %p980_p3, %p979_p13 }
  0x63   : > { %p982_p1 = pnand %p981_p7, %p975_p8 }
  0x65   : > { %985 = shalt.err (!%p982_p1)
}
  0x66   : > { %s986_s4 = scalar_lea.vmem %s247_s29, 128  ;;  %s1113_s13 = smov [#allocation5]  }
  0x67   : > { %p987_p2 = scmp.ne.s32.totalorder %s247_s29, %s986_s4  ;;  %s991_s28 = sshll.u32 %s1113_s13, 4  ;;  %s992_s28 = int_to_ptr.vmem [resolvable:$false] %s991_s28 }
  0x68   : > { %s993_s15 = scalar_lea.vmem %s992_s28, 256  ;;  %p994_p6 = scmp.lt.s32.totalorder %s247_s29, %s992_s28 }
  0x69   : > { %p989_p4 = pnand %p987_p2, %p943_p5  ;;  %p995_p11 = scmp.lt.s32.totalorder %s993_s15, %s986_s4 }
  0x6b   : > { %p990_p9 = pneg %p989_p4  ;;  %p996_p10 = por %p995_p11, %p994_p6 }
  0x6d   : > { %p997_p12 = pnand %p996_p10, %p990_p9 }
  0x6f   : > { %1000 = shalt.err (!%p997_p12)
}
  0x70   : > { %832 = dma.hbm_to_vmem [thread:$0]  (!%p1277_p0), %s1284_s11, 128, %s247_s29, %s233_s14  }
  0x71   : > { %p1481_p8 = scmp.ne.s32.totalorder %s1472_s27, 0 }
  0x72   : > { %s1337_s26 = sand.u32 (!%p1481_p8), 1, %s1083_s16   ;;  %p1482_p11 = scmp.ne.s32.totalorder (!%p1481_p8), %s1469_s25, 0 }
  0x73   : > { %255 = sbr.rel (%p1481_p8) target bundleno = 722 (0x2d2), region = 32  ;;  %s770_s12 = sshll.u32 (!%p1481_p8), %s1337_s26, 3 }
  0x74   : > { %s258_s24 = scalar_lea.sflag (!%p1481_p8), [#allocation3], %s1337_s26  ;;  %s1341_s7 = scalar_lea.vmem (!%p1481_p8), [#allocation2], %s770_s12 }
  0x7a   : > { %1062 = dma.done.wait (%p1482_p11), %s258_s24, 128  }
  0x7b   : > { %1064 = vsyncadd (%p1482_p11), %s258_s24, 4294967168  ;;  %s266_s8 = sand.u32 1, %s1184_s23   ;;  %s1348_s11 = scalar_lea.vmem [#allocation5], %s770_s12 }
  0x7c   : > { %s267_s27 = scalar_lea.sflag [#allocation6], %s266_s8 }
  0x7d   : > { %1066 = dma.done.wait (%p1482_p11), %s267_s27, 128  }
  0x7e   : > { %1068 = vsyncadd (%p1482_p11), %s267_s27, 4294967168  ;;  %p1483_p0 = scmp.eq.s32.totalorder %s1184_s23, 0 }
  0x80   : > { %1070 = dma.done.wait (%p1483_p0), [#allocation6], 256   ;;  %p1484_p5 = pmov %p1483_p0 }
  0x81   : > { %p312_p13 = scmp.lt.s32.totalorder %s1095_s19, 1  ;;  %p314_p3 = scmp.lt.s32.totalorder %s1091_s18, 1  ;;  %v1114_v0 = vmov 0.0|0.0   ;;  %vm1115_vm0 = vmmov 0   ;;  %v1116_v1 = vmov 0.0   ;;  %v332_v2 = vld [vmem:[#allocation7] sm:$0xff] }
  0x82   : > { %1072 = vsyncadd (%p1484_p5), [#allocation6], 4294967040  ;;  %809 = vmatprep.subr.bf16.mxu0 %v1114_v0  ;;  %798 = vmatprep.mubr.msk.f32.mxu0 %vm1115_vm0, %v1116_v1  ;;  %v333_v3 = vld [vmem:[#allocation7 + $0x8] sm:$0xff]  ;;  %v334_v4 = vmul.f32 0.25, %v332_v2  ;;  %vm325_vm1 = vcmask 130048   ;;  %vm330_vm2 = vcmask 253952  }
  0x83   : > { %s313_s29 = scalar_select %p312_p13, %s1095_s19, 1  ;;  %v335_v5 = vmul.f32 0.25, %v333_v3  ;;  %v336_v7 = vld [vmem:[%s1341_s7] sm:$0xff]  ;;  %vm416_vm3 = vcmask 261120   ;;  %v427_v15 = vld [vmem:[%s1348_s11] sm:$0xff]  ;;  %vm464_vm4 = vcmask 64512  }
  0x84   : > { %s315_s25 = scalar_select %p314_p3, %s1091_s18, 1  ;;  %801 = vmatprep.subr.mxu1 %v427_v15 }
  0x85   : > { %s774_s14 = sshll.u32 %s313_s29, 3  ;;  %v810_v6 = vpack.c.bf16 %v335_v5, %v334_v4  ;;  %s1378_s13 = scalar_lea.vmem [#allocation8], %s1337_s26  ;;  %802 = vmatpush3.msra.mxu1 %v427_v15 }
  0x86   : > { %s773_s5 = sshll.u32 %s315_s25, 2  ;;  %331 = vst.msk [vmem:[%s1378_s13] sm:$0x1] %vm330_vm2, %v1116_v1  ;;  %s782_s28 = sshll.u32 %s1095_s19, 1 }
  0x87   : > { %s318_s9 = sadd.s32 %s774_s14, %s773_s5  ;;  %811 = vmatpush3.bf16.msra.mxu0 %v810_v6  ;;  %s593_s15 = sadd.s32 %s1091_s18, %s782_s28 }
  0x88   : > { %s775_s23 = sshll.u32 %s318_s9, 3  ;;  %s783_s12 = sshll.u32 %s593_s15, 4 }
  0x89   : > { %s1365_s4 = scalar_lea.vmem %s1455_s3, %s775_s23  ;;  %s597_s24 = sshll.u32 %s1378_s13, 4  ;;  %s598_s24 = int_to_ptr.vmem [resolvable:$true] %s597_s24 }
  0x8a   : > { %326 = vst.msk [vmem:[%s1365_s4] sm:$0xff] %vm325_vm1, %v1116_v1  ;;  %327 = vst.msk [vmem:[%s1365_s4 + $0x8] sm:$0xff] %vm325_vm1, %v1116_v1  ;;  %799 = vmatmul.mubr.msk.f32.vlgmr.msra.gmra.mrb[0].mxu0 %vm325_vm1, %v336_v7  ;;  %s1485_s27 = sld [smem:[#allocation18_spill]]  ;;  %s580_s29 = scalar_lea.sflag [#allocation4], %s1337_s26 }
  0x8b   : > { %328 = vst.msk [vmem:[%s1365_s4 + $0x10] sm:$0xff] %vm325_vm1, %v1116_v1  ;;  %329 = vst.msk [vmem:[%s1365_s4 + $0x18] sm:$0xff] %vm325_vm1, %v1116_v1  ;;  %s1001_s25 = scalar_lea.vmem %s598_s24, 16  ;;  %p1486_p1 = scmp.ne.s32.totalorder %s1477_s30, 0 }
  0x8c   : > { %p1002_p7 = scmp.ne.s32.totalorder %s598_s24, %s1001_s25  ;;  %s1117_s14 = smov [#allocation8]  }
  0x8d   : > { %v415_v20 = vld [vmem:[%s1378_s13] sm:$0x1]  ;;  %s1005_s5 = sshll.u32 %s1117_s14, 4  ;;  %s1006_s5 = int_to_ptr.vmem [resolvable:$false] %s1005_s5 }
  0x8e   : > { %p1003_p2 = pnand %p1002_p7, %p1486_p1  ;;  %s1007_s9 = scalar_lea.vmem %s1006_s5, 32 }
  0x8f   : > { %p1008_p9 = scmp.lt.s32.totalorder %s598_s24, %s1006_s5  ;;  %p1009_p6 = scmp.lt.s32.totalorder %s1007_s9, %s1001_s25 }
  0x90   : > { %s1392_s11 = scalar_lea.hbm %s1485_s27, %s783_s12  ;;  %p1004_p4 = pneg %p1003_p2 }
  0x91   : > { %p1010_p10 = por %p1009_p6, %p1008_p9 }
  0x93   : > { %p1011_p12 = pnand %p1010_p10, %p1004_p4 }
 0x15d   : > { %v407_v8 = vpop.f32.mrb[0].mxu0 }
 0x15e   : > { %v777_v9 = vclamps-f32 %v407_v8, 10.0  ;;  %v800_v10 = vpop.f32.mrb[1].mxu0 }
 0x160   : > { %v413_v11 = vmul.f32 1.442695, %v777_v9 }
 0x162   : > { %911 = vpow2.f32 %v413_v11 }
 0x16c   : > { %v912_v12 = vpop.eup %911 }
 0x16d   : > { %v417_v13 = vsel %vm416_vm3, %v912_v12, 0.0  ;;  %432 = vxpose.xlu0.b32.start.end [1/1] (short) (narrow) %v912_v12, 32 }
 0x16e   : > { %v418_v14 = vrot.slane %v417_v13, 4 }
 0x170   : > { %v419_v16 = vadd.f32 %v418_v14, %v417_v13 }
 0x172   : > { %v420_v17 = vrot.slane %v419_v16, 2 }
 0x174   : > { %v421_v18 = vadd.f32 %v420_v17, %v419_v16 }
 0x176   : > { %v422_v19 = vrot.slane %v421_v18, 1 }
 0x178   : > { %v423_v21 = vadd.f32 %v422_v19, %v421_v18 }
 0x17a   : > { %v424_v22 = vadd.f32 %v423_v21, %v415_v20 }
 0x17c   : > { %426 = vst.msk [vmem:[%s1378_s13] sm:$0x1] %vm330_vm2, %v424_v22 }
 0x1ed   : > { %v448_v23 = vpop.trf.xlu0 }
 0x1ee   : > { %803 = vmatprep.mubr.msk.f32.mxu1 %vm464_vm4, %v448_v23 }
 0x1f1   : > { %v449_v24 = vpop.trf.xlu0 }
 0x1f2   : > { %804 = vmatmul.mubr.msk.f32.vlgmr.msra.gmra.mrb[0].mxu1 %vm464_vm4, %v449_v24 }
 0x1f5   : > { %v450_v25 = vpop.trf.xlu0 }
 0x1f6   : > { %806 = vmatprep.mubr.msk.f32.mxu1 %vm464_vm4, %v450_v25 }
 0x1f9   : > { %v451_v26 = vpop.trf.xlu0 }
 0x1fa   : > { %807 = vmatmul.mubr.msk.f32.gmra.mrb[2].mxu1 %vm464_vm4, %v451_v26 }
 0x1fb   : > { %1014 = shalt.err (!%p1011_p12)
}
 0x1fc   : > { %s1015_s18 = scalar_lea.hbm %s1392_s11, 16  ;;  %s1019_s23 = scalar_lea.hbm %s1485_s27, 64 }
 0x1fd   : > { %p1016_p8 = scmp.ne.s32.totalorder %s1392_s11, %s1015_s18  ;;  %p1020_p5 = scmp.lt.u32.totalorder %s1392_s11, %s1485_s27 }
 0x1fe   : > { %p1021_p13 = scmp.lt.u32.totalorder %s1019_s23, %s1015_s18  ;;  %p1023_p7 = scmp.lt.u32.totalorder %s1015_s18, %s1392_s11 }
 0x1ff   : > { %p1017_p11 = pnand %p1016_p8, %p1486_p1 }
 0x200   : > { %p1022_p3 = por %p1021_p13, %p1020_p5 }
 0x201   : > { %p1018_p0 = pneg %p1017_p11 }
 0x202   : > { %p1024_p2 = por %p1023_p7, %p1022_p3 }
 0x204   : > { %p1025_p4 = pnand %p1024_p2, %p1018_p0 }
 0x206   : > { %1028 = shalt.err (!%p1025_p4)
}
 0x207   : > { %820 = dma.vmem_to_hbm [thread:$0]  (%p1486_p1), %s598_s24, 16, %s1392_s11, %s580_s29   ;;  %v429_v27 = vld [vmem:[%s1365_s4 + $0x8] sm:$0xff]  ;;  %v428_v28 = vld [vmem:[%s1365_s4] sm:$0xff]  ;;  %v431_v33 = vld [vmem:[%s1365_s4 + $0x18] sm:$0xff] }
 0x208   : > { %v430_v34 = vld [vmem:[%s1365_s4 + $0x10] sm:$0xff] }
 0x2c5   : > { %v805_v29 = vpop.f32.mrb[0].mxu1 }
 0x2c6   : > { %v563_v30 = vadd.f32 %v805_v29, %v429_v27  ;;  %v543_v31 = vpop.f32.mrb[1].mxu1 }
 0x2c7   : > { %v562_v32 = vadd.f32 %v543_v31, %v428_v28 }
 0x2c8   : > { %567 = vst.msk [vmem:[%s1365_s4 + $0x8] sm:$0xff] %vm325_vm1, %v563_v30 }
 0x2c9   : > { %566 = vst.msk [vmem:[%s1365_s4] sm:$0xff] %vm325_vm1, %v562_v32 }
 0x2cd   : > { %v808_v35 = vpop.f32.mrb[2].mxu1 }
 0x2ce   : > { %v565_v36 = vadd.f32 %v808_v35, %v431_v33  ;;  %v553_v37 = vpop.f32.mrb[3].mxu1 }
 0x2cf   : > { %v564_v38 = vadd.f32 %v553_v37, %v430_v34 }
 0x2d0   : > { %569 = vst.msk [vmem:[%s1365_s4 + $0x18] sm:$0xff] %vm325_vm1, %v565_v36 }
 0x2d1   : > { %568 = vst.msk [vmem:[%s1365_s4 + $0x10] sm:$0xff] %vm325_vm1, %v564_v38 }
 0x2d2 PF: > { %s1487_s30 = sld [smem:[#allocation13_spill]]  ;;  %s1488_s13 = sld [smem:[#allocation14_spill]] }
 0x2d3   : > { %p840_p1 = scmp.ge.s32.totalorder %s1107_s22, 2 }
 0x2d8   : > { %s621_s28 = sand.u32 1, %s1487_s30   ;;  %p1489_p9 = scmp.ne.s32.totalorder %s1488_s13, 0 }
 0x2d9   : > { %s622_s15 = scalar_lea.sflag [#allocation4], %s621_s28 }
 0x2da   : > { %p834_p6 = pnand %p840_p1, %p1489_p9 }
 0x2dc   : > { %1074 = dma.done.wait (!%p834_p6), %s622_s15, 16  }
 0x2dd   : > { %1076 = vsyncadd (!%p834_p6), %s622_s15, 4294967280  ;;  %s24_s22 = sadd.s32 1, %s1107_s22   ;;  %s1490_s4 = sld [smem:[#allocation15_spill]] }
 0x2de   : > { %p21_p10 = scmp.ge.s32.totalorder %s24_s22, 6   ;;  %s1491_s12 = sld [smem:[#allocation16_spill]] }
 0x2df   : > { %s1492_s15 = smov %s1083_s16  ;;  %s1493_s16 = smov %s1087_s17 }
 0x2e0   : > { %s1494_s17 = smov %s1264_s2  ;;  %s1495_s18 = smov %s1099_s20 }
 0x2e1   : > { %s1496_s19 = smov %s1103_s21  ;;  %23 = sbr.rel (!%p21_p10) target bundleno = 12 (0xc), region = 110 }
 0x2e3   : > { %s1497_s20 = smov %s1490_s4 }
 0x2e4   : > { %s1498_s21 = smov %s1491_s12 }
 0x2e8   :  { %626 = vsyncpa [#allocation3], 1 }
 0x2e9   :  { %628 = vsyncpa [#allocation3 + $0x1], 1 }
 0x2ea   :  { %629 = vsyncpa [#allocation6], 1 }
 0x2eb   :  { %631 = vsyncpa [#allocation6 + $0x1], 1 }
 0x2ec   :  { %632 = vsyncpa [#allocation4], 1 }
 0x2ed   :  { %634 = vsyncpa [#allocation4 + $0x1], 1 }

</bundles_post_ra>
